<compile_context>
chip_gen: v7x
topology: tpu7x:2x2x1
jax: 0.10.0
libtpu: 0.0.40
codegen_flags: <defaults>
</compile_context>

<pallas_src>
import functools

import jax
import jax.numpy as jnp
import numpy as np
from jax.experimental import pallas as pl
from jax.experimental.pallas import tpu as pltpu


def _round_up(v, m):
    return (v + m - 1) // m * m


def _pad_to(a, shape):
    return jnp.pad(a, [(0, s - d) for d, s in zip(a.shape, shape)])


def sparse_moe_kernel(x_ref, wr_ref, br_ref, w1_ref, b1_ref, w2_ref, b2_ref,
                      out_ref, gates_ref, *, num_experts, active_experts, resident):
    e = pl.program_id(1)
    h = pl.program_id(2)

    xb = x_ref[...]                                              # (M, Dp) bf16

    # ---- Router: once per token tile (e==0, h==0), cached in VMEM scratch ----
    @pl.when((e == 0) & (h == 0))
    def _():
        logits = jnp.dot(xb, wr_ref[...],
                         preferred_element_type=jnp.float32) + br_ref[...]  # (M, E) f32
        # Counted k-th-largest threshold: matches torch.topk/jax.lax.top_k
        # thresholding (ties exactly AT the threshold keep all tied experts --
        # measure-zero for continuous inputs).
        cnt = jnp.zeros_like(logits)
        for j in range(num_experts):
            cnt = cnt + (logits[:, j:j + 1] > logits).astype(jnp.float32)
        thr = jnp.min(jnp.where(cnt < active_experts, logits, jnp.inf),
                      axis=-1, keepdims=True)
        masked = jnp.where(logits >= thr, logits, -jnp.inf)
        m = jnp.max(masked, axis=-1, keepdims=True)
        ex = jnp.exp(masked - m)
        denom = jnp.sum(ex, axis=-1, keepdims=True)
        gates_ref[...] = ex * pl.reciprocal(denom, approx=True)
        out_ref[...] = jnp.zeros_like(out_ref)

    # ---- Expert e, hidden-chunk h: gelu(x W1 + b1) W2 (+ b2 once), gate-weighted ----
    # TODO(synk): nn.Dropout(0.1) is identity in eval mode; training-time stochastic
    # dropout is not implemented.
    if resident:
        w1 = w1_ref[e]     # (Dp, Hp)   weights resident in VMEM, fetched once
        b1v = b1_ref[e]    # (1, Hp)
        w2 = w2_ref[e]     # (Hp, Dp)
        b2v = b2_ref[e]    # (1, Dp)
    else:
        w1 = w1_ref[0]     # (Dp, h_tile)  streamed per (expert, h-chunk)
        b1v = b1_ref[0]    # (1, h_tile)
        w2 = w2_ref[0]     # (h_tile, Dp)
        b2v = b2_ref[0]    # (1, Dp)

    hid = jnp.dot(xb, w1, preferred_element_type=jnp.float32) + b1v
    hid = 0.5 * hid * (1.0 + jax.lax.erf(hid * jnp.float32(0.7071067811865476)))  # exact GELU
    y = jnp.dot(hid.astype(jnp.bfloat16), w2, preferred_element_type=jnp.float32)
    # Add the (gate-weighted) output bias exactly once per expert (at h == 0).
    y = y + (h == 0).astype(jnp.float32) * b2v

    # Select this expert's gate column without a dynamic lane slice.
    col = jax.lax.broadcasted_iota(jnp.int32, gates_ref.shape, 1)
    gate = jnp.sum(jnp.where(col == e, gates_ref[...], 0.0),
                   axis=-1, keepdims=True)                                    # (M, 1)
    out_ref[...] += gate * y


def sparse_moe(x, wr, br, w1, b1, w2, b2, *, active_experts,
               m_tile=512, h_tile=None, force_resident=None):
    """x: (B, T, D). wr: (D, E), br: (1, E), w1: (E, D, 4D), b1: (E, 1, 4D),
    w2: (E, 4D, D), b2: (E, 1, D). Returns (B, T, D) f32."""
    B, T, D = x.shape
    E = wr.shape[1]
    H = w1.shape[2]
    N = B * T

    # Lane-dense padding: last dims to multiples of 128 (zero padding is exact:
    # padded hidden units have zero W1 cols / b1 / W2 rows -> contribute 0).
    Dp = _round_up(D, 128)
    Hp = _round_up(H, 128)

    try:
        info = pltpu.get_tpu_info()
        vmem_cap = int(getattr(info, "vmem_capacity_bytes", 64 * 1024 * 1024))
    except Exception:
        vmem_cap = 64 * 1024 * 1024

    # Resident-weights fast path: all expert weights fit in VMEM -> fetch once.
    w_bytes_res = E * (Dp * Hp + Hp * Dp) * 2 + E * (Hp + Dp) * 4
    if force_resident is None:
        resident = (2 * w_bytes_res) <= int(0.4 * vmem_cap)
    else:
        resident = bool(force_resident)

    # Hidden-dim tiling (only matters when streaming; keeps v7x under 64 MiB VMEM).
    if h_tile is None or resident:
        h_tile = Hp if resident else min(Hp, 2048)
    h_tile = _round_up(min(h_tile, Hp), 128)
    Hp = _round_up(Hp, h_tile)

    # Token tile: big by default (amortizes streamed weight traffic); multiple of 8.
    m_tile = max(8, min(m_tile, _round_up(N, 8)))
    if resident and N > 8:
        # Weights cost nothing extra per tile -> prefer >= 2 token tiles so the
        # "parallel" axis can shard across v7x's two TensorCores.
        m_tile = max(8, min(m_tile, _round_up((N + 1) // 2, 8)))
    Np = _round_up(N, m_tile)

    xf = _pad_to(x.reshape(N, D), (Np, Dp)).astype(jnp.bfloat16)   # bf16 activations
    wrp = _pad_to(wr, (Dp, E)).astype(jnp.bfloat16)                # bf16 router weight
    brp = br.astype(jnp.float32)
    w1p = _pad_to(w1, (E, Dp, Hp)).astype(jnp.bfloat16)            # bf16 expert weights
    b1p = _pad_to(b1, (E, 1, Hp)).astype(jnp.float32)
    w2p = _pad_to(w2, (E, Hp, Dp)).astype(jnp.bfloat16)
    b2p = _pad_to(b2, (E, 1, Dp)).astype(jnp.float32)

    Hk = Hp // h_tile
    grid = (Np // m_tile, E, Hk)

    if resident:
        w1_spec = pl.BlockSpec((E, Dp, Hp), lambda i, e, h: (0, 0, 0))
        b1_spec = pl.BlockSpec((E, 1, Hp), lambda i, e, h: (0, 0, 0))
        w2_spec = pl.BlockSpec((E, Hp, Dp), lambda i, e, h: (0, 0, 0))
        b2_spec = pl.BlockSpec((E, 1, Dp), lambda i, e, h: (0, 0, 0))
    else:
        w1_spec = pl.BlockSpec((1, Dp, h_tile), lambda i, e, h: (e, 0, h))
        b1_spec = pl.BlockSpec((1, 1, h_tile), lambda i, e, h: (e, 0, h))
        w2_spec = pl.BlockSpec((1, h_tile, Dp), lambda i, e, h: (e, h, 0))
        b2_spec = pl.BlockSpec((1, 1, Dp), lambda i, e, h: (e, 0, 0))

    # VMEM budget (no double-counted 2x factors); per-generation hard cap:
    # <=44 MiB on 64 MiB parts (v7x), <=100 MiB on 128 MiB parts (v5e/v6e).
    x_buf = 2 * m_tile * Dp * 2
    out_buf = 2 * m_tile * Dp * 4
    r_buf = 2 * (Dp * E * 2 + E * 4)
    if resident:
        w_buf = 2 * w_bytes_res
    else:
        w_buf = 2 * (Dp * h_tile * 2 + h_tile * 4 + h_tile * Dp * 2 + Dp * 4)
    live = m_tile * h_tile * 4 + m_tile * Dp * 4 + m_tile * max(E, 128) * 4
    need = x_buf + out_buf + r_buf + w_buf + live + (4 << 20)
    hard_cap = (44 << 20) if vmem_cap <= (64 << 20) else (100 << 20)
    vmem_limit = int(min(max(need, 16 << 20), hard_cap))

    kernel = functools.partial(sparse_moe_kernel, num_experts=E,
                               active_experts=active_experts, resident=resident)
    out = pl.pallas_call(
        kernel,
        out_shape=jax.ShapeDtypeStruct((Np, Dp), jnp.float32),
        grid_spec=pltpu.PrefetchScalarGridSpec(
            num_scalar_prefetch=0,
            grid=grid,
            in_specs=[
                pl.BlockSpec((m_tile, Dp), lambda i, e, h: (i, 0)),   # x: per token tile
                pl.BlockSpec((Dp, E), lambda i, e, h: (0, 0)),        # router weight: resident
                pl.BlockSpec((1, E), lambda i, e, h: (0, 0)),         # router bias: resident
                w1_spec, b1_spec, w2_spec, b2_spec,
            ],
            out_specs=pl.BlockSpec((m_tile, Dp), lambda i, e, h: (i, 0)),  # accumulator
            scratch_shapes=[pltpu.VMEM((m_tile, E), jnp.float32)],         # cached gates
        ),
        compiler_params=pltpu.CompilerParams(
            dimension_semantics=("parallel", "arbitrary", "arbitrary"),
            vmem_limit_bytes=vmem_limit),
    )(xf, wrp, brp, w1p, b1p, w2p, b2p)
    # TODO(synk): at real MoE scale, exploit top-k sparsity (sort tokens by expert and
    # pass group offsets via PrefetchScalarGridSpec scalar prefetch) instead of this
    # dense all-experts formulation.
    return out[:N, :D].reshape(B, T, D)


def ref_forward(x, wr, br, w1, b1, w2, b2, k):
    """Pure-JAX reference mirroring the PyTorch forward (eval-mode dropout), using the
    same bf16-operand / f32-accumulate matmuls as the kernel."""
    B, T, D = x.shape
    xb = x.reshape(-1, D).astype(jnp.bfloat16)
    logits = jnp.dot(xb, wr.astype(jnp.bfloat16),
                     preferred_element_type=jnp.float32) + br
    thr = jax.lax.top_k(logits, k)[0][..., -1:]
    masked = jnp.where(logits >= thr, logits, -jnp.inf)
    gates = jax.nn.softmax(masked, axis=-1)
    out = jnp.zeros((B * T, D), jnp.float32)
    for e in range(w1.shape[0]):
        h = jnp.dot(xb, w1[e].astype(jnp.bfloat16),
                    preferred_element_type=jnp.float32) + b1[e]
        h = jax.nn.gelu(h, approximate=False)
        y = jnp.dot(h.astype(jnp.bfloat16), w2[e].astype(jnp.bfloat16),
                    preferred_element_type=jnp.float32) + b2[e]
        out = out + gates[:, e:e + 1] * y
    return out.reshape(B, T, D)


if __name__ == "__main__":
    def make_params(key, D, E):
        ks = jax.random.split(key, 6)
        H = 4 * D
        wr = jax.random.normal(ks[0], (D, E), jnp.float32) * 0.1
        br = jax.random.normal(ks[1], (1, E), jnp.float32) * 0.1
        w1 = jax.random.normal(ks[2], (E, D, H), jnp.float32) * 0.1
        b1 = jax.random.normal(ks[3], (E, 1, H), jnp.float32) * 0.1
        w2 = jax.random.normal(ks[4], (E, H, D), jnp.float32) * 0.1
        b2 = jax.random.normal(ks[5], (E, 1, D), jnp.float32) * 0.1
        return wr, br, w1, b1, w2, b2

    key = jax.random.PRNGKey(0)
    k0, k1, k2, k3 = jax.random.split(key, 4)

    # Case 1: small shapes, auto config (VMEM-resident expert weights path).
    B, T, D, E, K = 2, 8, 32, 4, 2
    x = jax.random.normal(k0, (B, T, D), dtype=jnp.float32)
    params = make_params(k1, D, E)
    out = jax.block_until_ready(sparse_moe(x, *params, active_experts=K))
    ref = ref_forward(x, *params, K)
    np.testing.assert_allclose(np.asarray(out), np.asarray(ref), rtol=2e-3, atol=2e-3)

    # Case 2: exercise the streamed + hidden-dim-tiled path (the v7x large-model path):
    # 2 token tiles, per-(expert, h-chunk) weight streaming with 2 h-chunks.
    B2, T2, D2, E2, K2 = 2, 16, 64, 4, 2
    x2 = jax.random.normal(k2, (B2, T2, D2), dtype=jnp.float32)
    params2 = make_params(k3, D2, E2)
    out2 = jax.block_until_ready(
        sparse_moe(x2, *params2, active_experts=K2,
                   m_tile=16, h_tile=128, force_resident=False))
    ref2 = ref_forward(x2, *params2, K2)
    np.testing.assert_allclose(np.asarray(out2), np.asarray(ref2), rtol=2e-3, atol=2e-3)

    print("KERNEL_OK")
</pallas_src>

<mosaic_0001>
module attributes {stable_mosaic.version = 11 : i64} {
  func.func @sparse_moe_kernel(%arg0: i32, %arg1: i32, %arg2: i32, %arg3: memref<8x128xbf16, #tpu.memory_space<vmem>>, %arg4: memref<128x4xbf16, #tpu.memory_space<vmem>>, %arg5: memref<1x4xf32, #tpu.memory_space<vmem>>, %arg6: memref<4x128x128xbf16, #tpu.memory_space<vmem>>, %arg7: memref<4x1x128xf32, #tpu.memory_space<vmem>>, %arg8: memref<4x128x128xbf16, #tpu.memory_space<vmem>>, %arg9: memref<4x1x128xf32, #tpu.memory_space<vmem>>, %arg10: memref<8x128xf32, #tpu.memory_space<vmem>>, %arg11: memref<8x4xf32, #tpu.memory_space<vmem>>) attributes {dimension_semantics = [#tpu.dimension_semantics<parallel>, #tpu.dimension_semantics<arbitrary>, #tpu.dimension_semantics<arbitrary>], iteration_bounds = array<i64: 2, 4, 1>, scalar_prefetch = 0 : i64, scratch_operands = 1 : i64, tpu.core_type = #tpu.core_type<tc>, window_params = [{transform_indices = @transform_0, window_bounds = array<i64: 8, 128>}, {pipeline_mode = #tpu.pipeline_mode<synchronous>, transform_indices = @transform_1, window_bounds = array<i64: 128, 4>}, {pipeline_mode = #tpu.pipeline_mode<synchronous>, transform_indices = @transform_2, window_bounds = array<i64: 1, 4>}, {pipeline_mode = #tpu.pipeline_mode<synchronous>, transform_indices = @transform_3, window_bounds = array<i64: 4, 128, 128>}, {pipeline_mode = #tpu.pipeline_mode<synchronous>, transform_indices = @transform_4, window_bounds = array<i64: 4, 1, 128>}, {pipeline_mode = #tpu.pipeline_mode<synchronous>, transform_indices = @transform_5, window_bounds = array<i64: 4, 128, 128>}, {pipeline_mode = #tpu.pipeline_mode<synchronous>, transform_indices = @transform_6, window_bounds = array<i64: 4, 1, 128>}, {transform_indices = @transform_7, window_bounds = array<i64: 8, 128>}]} {
    %c0 = arith.constant 0 : index
    %c0_0 = arith.constant 0 : index
    %0 = vector.load %arg3[%c0, %c0_0] : memref<8x128xbf16, #tpu.memory_space<vmem>>, vector<8x128xbf16>
    %c0_i32 = arith.constant 0 : i32
    %1 = arith.cmpi eq, %arg1, %c0_i32 : i32
    %c0_i32_1 = arith.constant 0 : i32
    %2 = arith.cmpi eq, %arg2, %c0_i32_1 : i32
    %3 = arith.andi %1, %2 : i1
    %4 = arith.extui %3 : i1 to i32
    %c0_i32_2 = arith.constant 0 : i32
    %5 = arith.cmpi ne, %4, %c0_i32_2 : i32
    scf.if %5 {
      %c0_24 = arith.constant 0 : index
      %c0_25 = arith.constant 0 : index
      %51 = vector.load %arg4[%c0_24, %c0_25] : memref<128x4xbf16, #tpu.memory_space<vmem>>, vector<128x4xbf16>
      %cst_26 = arith.constant dense<0.000000e+00> : vector<8x4xf32>
      %52 = tpu.matmul %0, %51, %cst_26 {dimension_numbers = #tpu.dot_dimension_numbers<[1], [0], [0], [1], [0, 0, 1, 1], [], []>} : vector<8x128xbf16>, vector<128x4xbf16>, vector<8x4xf32> -> vector<8x4xf32>
      %c0_27 = arith.constant 0 : index
      %c0_28 = arith.constant 0 : index
      %53 = vector.load %arg5[%c0_27, %c0_28] : memref<1x4xf32, #tpu.memory_space<vmem>>, vector<1x4xf32>
      %54 = vector.broadcast %53 : vector<1x4xf32> to vector<8x4xf32>
      %55 = arith.addf %52, %54 : vector<8x4xf32>
      %cst_29 = arith.constant 0.000000e+00 : f32
      %56 = vector.broadcast %cst_29 : f32 to vector<8x4xf32>
      %57 = vector.extract_strided_slice %55 {offsets = [0, 0], sizes = [8, 1], strides = [1, 1]} : vector<8x4xf32> to vector<8x1xf32>
      %58 = vector.broadcast %57 : vector<8x1xf32> to vector<8x4xf32>
      %59 = arith.cmpf ogt, %58, %55 : vector<8x4xf32>
      %60 = arith.extui %59 : vector<8x4xi1> to vector<8x4xi32>
      %61 = arith.sitofp %60 : vector<8x4xi32> to vector<8x4xf32>
      %62 = arith.addf %56, %61 : vector<8x4xf32>
      %63 = vector.extract_strided_slice %55 {offsets = [0, 1], sizes = [8, 1], strides = [1, 1]} : vector<8x4xf32> to vector<8x1xf32>
      %64 = vector.broadcast %63 : vector<8x1xf32> to vector<8x4xf32>
      %65 = arith.cmpf ogt, %64, %55 : vector<8x4xf32>
      %66 = arith.extui %65 : vector<8x4xi1> to vector<8x4xi32>
      %67 = arith.sitofp %66 : vector<8x4xi32> to vector<8x4xf32>
      %68 = arith.addf %62, %67 : vector<8x4xf32>
      %69 = vector.extract_strided_slice %55 {offsets = [0, 2], sizes = [8, 1], strides = [1, 1]} : vector<8x4xf32> to vector<8x1xf32>
      %70 = vector.broadcast %69 : vector<8x1xf32> to vector<8x4xf32>
      %71 = arith.cmpf ogt, %70, %55 : vector<8x4xf32>
      %72 = arith.extui %71 : vector<8x4xi1> to vector<8x4xi32>
      %73 = arith.sitofp %72 : vector<8x4xi32> to vector<8x4xf32>
      %74 = arith.addf %68, %73 : vector<8x4xf32>
      %75 = vector.extract_strided_slice %55 {offsets = [0, 3], sizes = [8, 1], strides = [1, 1]} : vector<8x4xf32> to vector<8x1xf32>
      %76 = vector.broadcast %75 : vector<8x1xf32> to vector<8x4xf32>
      %77 = arith.cmpf ogt, %76, %55 : vector<8x4xf32>
      %78 = arith.extui %77 : vector<8x4xi1> to vector<8x4xi32>
      %79 = arith.sitofp %78 : vector<8x4xi32> to vector<8x4xf32>
      %80 = arith.addf %74, %79 : vector<8x4xf32>
      %cst_30 = arith.constant 2.000000e+00 : f32
      %81 = vector.broadcast %cst_30 : f32 to vector<8x4xf32>
      %82 = arith.cmpf olt, %80, %81 : vector<8x4xf32>
      %cst_31 = arith.constant 0x7F800000 : f32
      %83 = vector.broadcast %cst_31 : f32 to vector<8x4xf32>
      %84 = arith.select %82, %55, %83 : vector<8x4xi1>, vector<8x4xf32>
      %cst_32 = arith.constant dense<0x7F800000> : vector<8xf32>
      %85 = vector.multi_reduction <minimumf>, %84, %cst_32 [1] : vector<8x4xf32> to vector<8xf32>
      %86 = vector.shape_cast %85 : vector<8xf32> to vector<8x1xf32>
      %87 = vector.broadcast %86 : vector<8x1xf32> to vector<8x4xf32>
      %88 = arith.cmpf oge, %55, %87 : vector<8x4xf32>
      %cst_33 = arith.constant 0xFF800000 : f32
      %89 = vector.broadcast %cst_33 : f32 to vector<8x4xf32>
      %90 = arith.select %88, %55, %89 : vector<8x4xi1>, vector<8x4xf32>
      %cst_34 = arith.constant dense<0xFF800000> : vector<8xf32>
      %91 = vector.multi_reduction <maximumf>, %90, %cst_34 [1] : vector<8x4xf32> to vector<8xf32>
      %92 = vector.shape_cast %91 : vector<8xf32> to vector<8x1xf32>
      %93 = vector.broadcast %92 : vector<8x1xf32> to vector<8x4xf32>
      %94 = arith.subf %90, %93 : vector<8x4xf32>
      %95 = math.exp %94 : vector<8x4xf32>
      %cst_35 = arith.constant dense<0.000000e+00> : vector<8xf32>
      %96 = vector.multi_reduction <add>, %95, %cst_35 [1] : vector<8x4xf32> to vector<8xf32>
      %97 = vector.shape_cast %96 : vector<8xf32> to vector<8x1xf32>
      %98 = tpu.reciprocal %97 {approx = true} : vector<8x1xf32> -> vector<8x1xf32>
      %99 = vector.broadcast %98 : vector<8x1xf32> to vector<8x4xf32>
      %100 = arith.mulf %95, %99 : vector<8x4xf32>
      %c0_36 = arith.constant 0 : index
      %c0_37 = arith.constant 0 : index
      %101 = vector.load %arg11[%c0_36, %c0_37] : memref<8x4xf32, #tpu.memory_space<vmem>>, vector<8x4xf32>
      tpu.vector_store %arg11[%c0_36, %c0_37], %100 {strides = array<i32>} : memref<8x4xf32, #tpu.memory_space<vmem>>, vector<8x4xf32>,
      %cst_38 = arith.constant 0.000000e+00 : f32
      %102 = vector.broadcast %cst_38 : f32 to vector<8x128xf32>
      %c0_39 = arith.constant 0 : index
      %c0_40 = arith.constant 0 : index
      %103 = vector.load %arg10[%c0_39, %c0_40] : memref<8x128xf32, #tpu.memory_space<vmem>>, vector<8x128xf32>
      tpu.vector_store %arg10[%c0_39, %c0_40], %102 {strides = array<i32>} : memref<8x128xf32, #tpu.memory_space<vmem>>, vector<8x128xf32>,
    } else {
    }
    %6 = arith.index_cast %arg1 : i32 to index
    %c0_3 = arith.constant 0 : index
    %c0_4 = arith.constant 0 : index
    %7 = vector.load %arg6[%6, %c0_3, %c0_4] : memref<4x128x128xbf16, #tpu.memory_space<vmem>>, vector<1x128x128xbf16>
    %8 = vector.shape_cast %7 : vector<1x128x128xbf16> to vector<128x128xbf16>
    %9 = arith.index_cast %arg1 : i32 to index
    %c0_5 = arith.constant 0 : index
    %c0_6 = arith.constant 0 : index
    %10 = vector.load %arg7[%9, %c0_5, %c0_6] : memref<4x1x128xf32, #tpu.memory_space<vmem>>, vector<1x1x128xf32>
    %11 = vector.shape_cast %10 : vector<1x1x128xf32> to vector<1x128xf32>
    %12 = arith.index_cast %arg1 : i32 to index
    %c0_7 = arith.constant 0 : index
    %c0_8 = arith.constant 0 : index
    %13 = vector.load %arg8[%12, %c0_7, %c0_8] : memref<4x128x128xbf16, #tpu.memory_space<vmem>>, vector<1x128x128xbf16>
    %14 = vector.shape_cast %13 : vector<1x128x128xbf16> to vector<128x128xbf16>
    %15 = arith.index_cast %arg1 : i32 to index
    %c0_9 = arith.constant 0 : index
    %c0_10 = arith.constant 0 : index
    %16 = vector.load %arg9[%15, %c0_9, %c0_10] : memref<4x1x128xf32, #tpu.memory_space<vmem>>, vector<1x1x128xf32>
    %17 = vector.shape_cast %16 : vector<1x1x128xf32> to vector<1x128xf32>
    %cst = arith.constant dense<0.000000e+00> : vector<8x128xf32>
    %18 = tpu.matmul %0, %8, %cst {dimension_numbers = #tpu.dot_dimension_numbers<[1], [0], [0], [1], [0, 0, 1, 1], [], []>} : vector<8x128xbf16>, vector<128x128xbf16>, vector<8x128xf32> -> vector<8x128xf32>
    %19 = vector.broadcast %11 : vector<1x128xf32> to vector<8x128xf32>
    %20 = arith.addf %18, %19 : vector<8x128xf32>
    %cst_11 = arith.constant 5.000000e-01 : f32
    %21 = vector.broadcast %cst_11 : f32 to vector<8x128xf32>
    %22 = arith.mulf %21, %20 : vector<8x128xf32>
    %cst_12 = arith.constant 0.707106769 : f32
    %23 = vector.broadcast %cst_12 : f32 to vector<8x128xf32>
    %24 = arith.mulf %20, %23 : vector<8x128xf32>
    %25 = math.erf %24 : vector<8x128xf32>
    %cst_13 = arith.constant 1.000000e+00 : f32
    %26 = vector.broadcast %cst_13 : f32 to vector<8x128xf32>
    %27 = arith.addf %26, %25 : vector<8x128xf32>
    %28 = arith.mulf %22, %27 : vector<8x128xf32>
    %29 = arith.truncf %28 : vector<8x128xf32> to vector<8x128xbf16>
    %cst_14 = arith.constant dense<0.000000e+00> : vector<8x128xf32>
    %30 = tpu.matmul %29, %14, %cst_14 {dimension_numbers = #tpu.dot_dimension_numbers<[1], [0], [0], [1], [0, 0, 1, 1], [], []>} : vector<8x128xbf16>, vector<128x128xbf16>, vector<8x128xf32> -> vector<8x128xf32>
    %c0_i32_15 = arith.constant 0 : i32
    %31 = arith.cmpi eq, %arg2, %c0_i32_15 : i32
    %32 = arith.extui %31 : i1 to i32
    %33 = arith.sitofp %32 : i32 to f32
    %34 = vector.broadcast %33 : f32 to vector<1x128xf32>
    %35 = arith.mulf %34, %17 : vector<1x128xf32>
    %36 = vector.broadcast %35 : vector<1x128xf32> to vector<8x128xf32>
    %37 = arith.addf %30, %36 : vector<8x128xf32>
    %38 = tpu.iota {dimensions = array<i32: 1>} : vector<8x4xi32>
    %39 = vector.broadcast %arg1 : i32 to vector<8x4xi32>
    %40 = arith.cmpi eq, %38, %39 : vector<8x4xi32>
    %c0_16 = arith.constant 0 : index
    %c0_17 = arith.constant 0 : index
    %41 = vector.load %arg11[%c0_16, %c0_17] : memref<8x4xf32, #tpu.memory_space<vmem>>, vector<8x4xf32>
    %cst_18 = arith.constant 0.000000e+00 : f32
    %42 = vector.broadcast %cst_18 : f32 to vector<8x4xf32>
    %43 = arith.select %40, %41, %42 : vector<8x4xi1>, vector<8x4xf32>
    %cst_19 = arith.constant dense<0.000000e+00> : vector<8xf32>
    %44 = vector.multi_reduction <add>, %43, %cst_19 [1] : vector<8x4xf32> to vector<8xf32>
    %45 = vector.shape_cast %44 : vector<8xf32> to vector<8x1xf32>
    %c0_20 = arith.constant 0 : index
    %c0_21 = arith.constant 0 : index
    %46 = vector.load %arg10[%c0_20, %c0_21] : memref<8x128xf32, #tpu.memory_space<vmem>>, vector<8x128xf32>
    %47 = vector.broadcast %45 : vector<8x1xf32> to vector<8x128xf32>
    %48 = arith.mulf %47, %37 : vector<8x128xf32>
    %49 = arith.addf %46, %48 : vector<8x128xf32>
    %c0_22 = arith.constant 0 : index
    %c0_23 = arith.constant 0 : index
    %50 = vector.load %arg10[%c0_22, %c0_23] : memref<8x128xf32, #tpu.memory_space<vmem>>, vector<8x128xf32>
    tpu.vector_store %arg10[%c0_22, %c0_23], %49 {strides = array<i32>} : memref<8x128xf32, #tpu.memory_space<vmem>>, vector<8x128xf32>,
    return
  }
  func.func @transform_0(%arg0: i32, %arg1: i32, %arg2: i32) -> (i32, i32) {
    %c0_i32 = arith.constant 0 : i32
    %c0_i32_0 = arith.constant 0 : i32
    return %arg0, %c0_i32 : i32, i32
  }
  func.func @transform_1(%arg0: i32, %arg1: i32, %arg2: i32) -> (i32, i32) {
    %c0_i32 = arith.constant 0 : i32
    %c0_i32_0 = arith.constant 0 : i32
    %c0_i32_1 = arith.constant 0 : i32
    return %c0_i32, %c0_i32_0 : i32, i32
  }
  func.func @transform_2(%arg0: i32, %arg1: i32, %arg2: i32) -> (i32, i32) {
    %c0_i32 = arith.constant 0 : i32
    %c0_i32_0 = arith.constant 0 : i32
    %c0_i32_1 = arith.constant 0 : i32
    return %c0_i32, %c0_i32_0 : i32, i32
  }
  func.func @transform_3(%arg0: i32, %arg1: i32, %arg2: i32) -> (i32, i32, i32) {
    %c0_i32 = arith.constant 0 : i32
    %c0_i32_0 = arith.constant 0 : i32
    %c0_i32_1 = arith.constant 0 : i32
    %c0_i32_2 = arith.constant 0 : i32
    return %c0_i32, %c0_i32_0, %c0_i32_1 : i32, i32, i32
  }
  func.func @transform_4(%arg0: i32, %arg1: i32, %arg2: i32) -> (i32, i32, i32) {
    %c0_i32 = arith.constant 0 : i32
    %c0_i32_0 = arith.constant 0 : i32
    %c0_i32_1 = arith.constant 0 : i32
    %c0_i32_2 = arith.constant 0 : i32
    return %c0_i32, %c0_i32_0, %c0_i32_1 : i32, i32, i32
  }
  func.func @transform_5(%arg0: i32, %arg1: i32, %arg2: i32) -> (i32, i32, i32) {
    %c0_i32 = arith.constant 0 : i32
    %c0_i32_0 = arith.constant 0 : i32
    %c0_i32_1 = arith.constant 0 : i32
    %c0_i32_2 = arith.constant 0 : i32
    return %c0_i32, %c0_i32_0, %c0_i32_1 : i32, i32, i32
  }
  func.func @transform_6(%arg0: i32, %arg1: i32, %arg2: i32) -> (i32, i32, i32) {
    %c0_i32 = arith.constant 0 : i32
    %c0_i32_0 = arith.constant 0 : i32
    %c0_i32_1 = arith.constant 0 : i32
    %c0_i32_2 = arith.constant 0 : i32
    return %c0_i32, %c0_i32_0, %c0_i32_1 : i32, i32, i32
  }
  func.func @transform_7(%arg0: i32, %arg1: i32, %arg2: i32) -> (i32, i32) {
    %c0_i32 = arith.constant 0 : i32
    %c0_i32_0 = arith.constant 0 : i32
    return %arg0, %c0_i32 : i32, i32
  }
}

</mosaic_0001>

<bundles_post_ra>
// kernel: tpu_custom_call.1
= control target key start
LH: loop header
LB: loop body
LE: loop exit
PB: predicated region body
PF: predicated region fallthrough
CT: control target
= control target key end

     0   :  { %12 = vsyncpa [#allocation4], 0  ;;  %s1630_s0 = inlined_call_operand.vmem [shape: bf16[16,128], index: 0, kind: input, shape index: {}]   ;;  %s1631_s1 = inlined_call_operand.vmem [shape: bf16[128,4], index: 1, kind: input, shape index: {}]   ;;  %s1632_s2 = inlined_call_operand.vmem [shape: f32[1,4], index: 2, kind: input, shape index: {}]   ;;  %s1633_s3 = inlined_call_operand.hbm [shape: bf16[4,128,128], index: 3, kind: input, shape index: {}]   ;;  %s1634_s4 = inlined_call_operand.vmem [shape: f32[4,1,128], index: 4, kind: input, shape index: {}]   ;;  %s1635_s5 = inlined_call_operand.hbm [shape: bf16[4,128,128], index: 5, kind: input, shape index: {}]   ;;  %s1636_s6 = inlined_call_operand.vmem [shape: f32[4,1,128], index: 6, kind: input, shape index: {}]   ;;  %s1637_s7 = inlined_call_operand.hbm [shape: f32[16,128], index: 7, kind: output, shape index: {}]  }
   0x1   :  { %13 = vsyncpa [#allocation7], 0 }
   0x2   :  { %14 = vsyncpa [#allocation5], 0 }
   0x3   :  { %16 = vsyncpa [#allocation5 + $0x1], 0  ;;  %s1354_s24 = smov 0   ;;  %s1356_s25 = smov 0  }
   0x4   :  { %s1358_s26 = smov 0   ;;  %s1360_s27 = smov 0  }
   0x5   :  { %s1362_s28 = smov 0   ;;  %s1364_s29 = smov 0  }
   0x6   :  { %s1366_s30 = smov 0   ;;  %s1368_s8 = smov 0  }
   0x7 LB: > { %1647 = sst [smem:[#allocation12_spill]] %s1279_s26  ;;  %s864_s9 = sadd.s32 4294967295, %s1299_s8   ;;  %s1299_s8 = sphi %s1368_s8, %s22_s8   ;;  %s1295_s30 = sphi %s1366_s30, %s1669_s30   ;;  %s1291_s29 = sphi %s1364_s29, %s1668_s29   ;;  %s1287_s28 = sphi %s1362_s28, %s1667_s28   ;;  %s1283_s27 = sphi %s1360_s27, %s1666_s27   ;;  %s1279_s26 = sphi %s1358_s26, %s1665_s26   ;;  %s1275_s25 = sphi %s1356_s25, %s1671_s25   ;;  %s1271_s24 = sphi %s1354_s24, %s1670_s24  }
   0x8   : > { %1648 = sst [smem:[#allocation13_spill]] %s1291_s29  ;;  %s865_s10 = sadd.s32 4294967294, %s1299_s8  }
   0x9   : > { %1649 = sst [smem:[#allocation14_spill]] %s1295_s30  ;;  %s37_s11 = sadd.s32 1, %s1291_s29 }
   0xa   : > { %s41_s12 = sadd.s32 1, %s1295_s30  ;;  %p39_p0 = scmp.ge.s32.totalorder %s37_s11, 4 }
   0xb   : > { %s200_s13 = sadd.s32 1, %s1279_s26  ;;  %p210_p1 = scmp.ne.s32.totalorder %s1279_s26, %s1275_s25 }
   0xc   : > { %p211_p2 = scmp.eq.s32.totalorder %s864_s9, 7  ;;  %s1673_s11 = smov (%p39_p0, %s37_s11), 0 }
   0xd   : > { %1650 = sst [smem:[#allocation15_spill]] %s1673_s11  ;;  %s1675_s12 = smov (!%p39_p0, %s41_s12), %s1295_s30 }
   0xe   : > { %p1404_p3 = por %p211_p2, %p210_p1  ;;  %p216_p4 = scmp.ne.s32.totalorder %s1275_s25, %s1271_s24 }
   0xf   : > { %p43_p5 = scmp.ge.s32.totalorder %s1675_s12, 2  ;;  %p217_p6 = scmp.eq.s32.totalorder %s865_s10, 7 }
  0x10   : > { %s1651_s14 = scalar_select %p1404_p3, 1, 0 }
  0x11   : > { %p866_p7 = scmp.ge.s32.totalorder %s1299_s8, 1  ;;  %p224_p8 = scmp.lt.s32.totalorder %s1299_s8, 9 }
  0x12   : > { %s1677_s12 = smov (%p43_p5, %s1675_s12), 0  ;;  %p1414_p9 = por %p217_p6, %p216_p4 }
  0x13   : > { %1652 = sst [smem:[#allocation16_spill]] %s1677_s12  ;;  %p1418_p10 = pnand %p866_p7, %p224_p8 }
  0x14   : > { %s1653_s15 = scalar_select %p1414_p9, 1, 0 }
  0x15   : > { %s1655_s16 = scalar_select %p1418_p10, 1, 0 }
  0x16   : > { %1654 = sst [smem:[#allocation17_spill]] %s1653_s15  ;;  %s197_s17 = ssub.s32 %s1295_s30, %s1677_s12 }
  0x17   : > { %p198_p11 = scmp.eq.s32.totalorder %s197_s17, 0  ;;  %p1014_p12 = pneg %p1418_p10 }
  0x18   : > { %p1426_p13 = scmp.eq.s32.totalorder %s864_s9, 0  ;;  %s1301_s20 = smov [#allocation3]  }
  0x19   : > { %s1431_s19 = scalar_select %p198_p11, %s1279_s26, %s200_s13  }
  0x1a   : > { %s1656_s18 = scalar_select %p1426_p13, 1, 0 }
  0x1b   : > { %1657 = sst [smem:[#allocation18_spill]] %s1431_s19  ;;  %s242_s21 = sshll.u32 %s1301_s20, 4  ;;  %s243_s21 = int_to_ptr.vmem [resolvable:$true] %s242_s21 }
  0x1c   : > { %p1435_p0 = pnand %p1426_p13, %p1014_p12  ;;  %s1141_s9 = scalar_lea.hbm %s1633_s3, 4096 }
  0x1d   : > { %p1142_p1 = scmp.ne.s32.totalorder %s1633_s3, %s1141_s9  ;;  %p1148_p6 = scmp.lt.u32.totalorder %s1141_s9, %s1633_s3 }
  0x1e   : > { %p1143_p2 = pneg %p1435_p0 }
  0x20   : > { %p1144_p4 = pnand %p1143_p2, %p1142_p1 }
  0x22   : > { %p1145_p5 = pneg %p1144_p4 }
  0x24   : > { %p1150_p7 = pnand %p1148_p6, %p1145_p5 }
  0x26   : > { %1153 = shalt.err (!%p1150_p7)
}
  0x27   : > { %s1154_s11 = scalar_lea.vmem %s243_s21, 4096  ;;  %p1162_p9 = scmp.lt.s32.totalorder %s243_s21, %s243_s21 }
  0x28   : > { %p1155_p8 = scmp.ne.s32.totalorder %s243_s21, %s1154_s11  ;;  %p1163_p3 = scmp.lt.s32.totalorder %s1154_s11, %s1154_s11 }
  0x2a   : > { %p1157_p11 = pnand %p1155_p8, %p1143_p2  ;;  %p1164_p13 = por %p1163_p3, %p1162_p9 }
  0x2c   : > { %p1158_p12 = pneg %p1157_p11 }
  0x2e   : > { %p1165_p10 = pnand %p1164_p13, %p1158_p12 }
  0x30   : > { %1168 = shalt.err (!%p1165_p10)
}
  0x31   : > { %s1302_s12 = smov 64   ;;  %s1303_s23 = smov 4  }
  0x32   : > { %1017 = dma.hbm_to_vmem [thread:$0]  (!%p1435_p0), %s1633_s3, 4096, %s243_s21, [#allocation4], %s1302_s12, %s1302_s12, %s1303_s23  }
  0x33   : > { %s1304_s17 = smov [#allocation6]   ;;  %s1169_s29 = scalar_lea.hbm %s1635_s5, 4096 }
  0x34   : > { %s258_s13 = sshll.u32 %s1304_s17, 4  ;;  %p1170_p3 = scmp.ne.s32.totalorder %s1635_s5, %s1169_s29  ;;  %s259_s13 = int_to_ptr.vmem [resolvable:$true] %s258_s13 }
  0x35   : > { %p1176_p13 = scmp.lt.u32.totalorder %s1169_s29, %s1635_s5 }
  0x36   : > { %p1172_p9 = pnand %p1170_p3, %p1143_p2 }
  0x38   : > { %p1173_p10 = pneg %p1172_p9 }
  0x3a   : > { %p1178_p1 = pnand %p1176_p13, %p1173_p10 }
  0x3c   : > { %1181 = shalt.err (!%p1178_p1)
}
  0x3d   : > { %s1182_s21 = scalar_lea.vmem %s259_s13, 4096  ;;  %p1190_p7 = scmp.lt.s32.totalorder %s259_s13, %s259_s13 }
  0x3e   : > { %p1183_p4 = scmp.ne.s32.totalorder %s259_s13, %s1182_s21  ;;  %p1191_p8 = scmp.lt.s32.totalorder %s1182_s21, %s1182_s21 }
  0x40   : > { %p1185_p5 = pnand %p1183_p4, %p1143_p2  ;;  %p1192_p11 = por %p1191_p8, %p1190_p7 }
  0x42   : > { %p1186_p6 = pneg %p1185_p5 }
  0x44   : > { %p1193_p12 = pnand %p1192_p11, %p1186_p6 }
  0x46   : > { %1196 = shalt.err (!%p1193_p12)
}
  0x47   : > { %1020 = dma.hbm_to_vmem [thread:$0]  (!%p1435_p0), %s1635_s5, 4096, %s259_s13, [#allocation7], %s1302_s12, %s1302_s12, %s1303_s23  }
  0x48   : > { %p1659_p3 = scmp.ne.s32.totalorder %s1655_s16, 0 }
  0x49   : > { %p1660_p9 = scmp.ne.s32.totalorder (!%p1659_p3), %s1656_s18, 0 }
  0x4a   : > { %284 = sbr.rel (%p1659_p3) target bundleno = 1436 (0x59c), region = 48 }
  0x51   : > { %1258 = dma.done.wait (%p1660_p9), [#allocation4], 4096  }
  0x52   : > { %1260 = vsyncadd (%p1660_p9), [#allocation4], 4294963200 }
  0x53   : > { %1262 = dma.done.wait (%p1660_p9), [#allocation7], 4096  }
  0x54   : > { %1264 = vsyncadd (%p1660_p9), [#allocation7], 4294963200  ;;  %p319_p0 = scmp.lt.s32.totalorder %s1287_s28, 1  ;;  %s316_s26 = sand.u32 1, %s1275_s25  }
  0x55   : > { %s873_s29 = sshll.u32 %s316_s26, 3  ;;  %p325_p2 = scmp.eq.s32.totalorder %s1283_s27, 0 }
  0x56   : > { %s320_s15 = scalar_select %p319_p0, %s1287_s28, 1 }
  0x57   : > { %s1502_s18 = scalar_lea.vmem [#allocation8], %s873_s29  ;;  %330 = sbr.rel (!%p325_p2) target bundleno = 937 (0x3a9), region = 60  ;;  %v1111_v1 = vld [vmem:[%s1631_s1] sm:$0xff] (%p325_p2)   ;;  %v1305_v2 = vmov (%p325_p2), 0.0   ;;  %v1112_v3 = vld [vmem:[%s1631_s1 + $0x8] sm:$0xff] (%p325_p2)   ;;  %vm1306_vm0 = vmmov (%p325_p2), 0  }
  0x58   : > { %s874_s16 = sshll.u32 %s320_s15, 2  ;;  %944 = vmatprep.subr.bf16.mxu0 (%p325_p2), %v1305_v2  ;;  %495 = vst [vmem:[%s1502_s18] sm:$0xff] (%p325_p2), %v1305_v2  ;;  %960 = vmatprep.mubr.msk.bf16.mxu0 (%p325_p2), %vm1306_vm0, %v1305_v2  ;;  %v1113_v4 = vld [vmem:[%s1631_s1 + $0x10] sm:$0xff] (%p325_p2)   ;;  %v1114_v5 = vld [vmem:[%s1631_s1 + $0x18] sm:$0xff] (%p325_p2)   ;;  %v1115_v6 = vld [vmem:[%s1631_s1 + $0x20] sm:$0xff] (%p325_p2)   ;;  %v1307_v10 = vmov (%p325_p2), 2   ;;  %v1308_v11 = vmov (%p325_p2), 0  }
  0x59   : > { %s322_s23 = scalar_lea.vmem %s1630_s0, %s874_s16  ;;  %945 = vmatpush3.bf16.msra.mxu0 (%p325_p2), %v1111_v1  ;;  %v1116_v7 = vld [vmem:[%s1631_s1 + $0x28] sm:$0xff] (%p325_p2)   ;;  %v1117_v8 = vld [vmem:[%s1631_s1 + $0x30] sm:$0xff] (%p325_p2)   ;;  %v1118_v9 = vld [vmem:[%s1631_s1 + $0x38] sm:$0xff] (%p325_p2)   ;;  %1108 = vset.pattern.permute.xlu1 (%p325_p2), %v1307_v10  ;;  %v1309_v18 = vmov (%p325_p2), 3   ;;  %v1310_v19 = vmov (%p325_p2), 1   ;;  %vm477_vm5 = vcmask (%p325_p2), 31744  }
  0x5a   : > { %v1500_v0 = vld [vmem:[%s322_s23] sm:$0xf]  ;;  %946 = vmatprep.subr.bf16.mxu0 (%p325_p2), %v1305_v2  ;;  %1106 = vset.pattern.permute.xlu0 (%p325_p2), %v1308_v11 }
  0x5b   : > { %v876_v12 = vld [vmem:[%s1632_s2] ss:$0 sm:$0xff] (%p325_p2) }
  0x5d   : > { %947 = vmatpush3.bf16.msra.mxu0 (%p325_p2), %v1112_v3 }
  0x5e   : > { %948 = vmatprep.subr.bf16.mxu0 %v1305_v2 }
  0x61   : > { %949 = vmatpush3.bf16.msra.mxu0 %v1113_v4 }
  0x62   : > { %950 = vmatprep.subr.bf16.mxu0 %v1305_v2 }
  0x65   : > { %951 = vmatpush3.bf16.msra.mxu0 %v1114_v5 }
  0x66   : > { %952 = vmatprep.subr.bf16.mxu0 %v1305_v2 }
  0x69   : > { %953 = vmatpush3.bf16.msra.mxu0 %v1115_v6 }
  0x6a   : > { %954 = vmatprep.subr.bf16.mxu0 %v1305_v2 }
  0x6d   : > { %955 = vmatpush3.bf16.msra.mxu0 %v1116_v7 }
  0x6e   : > { %956 = vmatprep.subr.bf16.mxu0 %v1305_v2 }
  0x71   : > { %957 = vmatpush3.bf16.msra.mxu0 %v1117_v8 }
  0x72   : > { %958 = vmatprep.subr.bf16.mxu0 %v1305_v2 }
  0x75   : > { %959 = vmatpush3.bf16.msra.mxu0 %v1118_v9 }
  0x78   : > { %961 = vmatmul.mubr.bf16.vlgmr.msra.gmra.mrb[0].mxu0 %v1500_v0 }
 0x14b   : > { %v436_v13 = vpop.f32.mrb[0].mxu0 }
 0x14c   : > { %v437_v14 = vadd.f32 %v876_v12, %v436_v13  ;;  %v962_v15 = vpop.f32.mrb[1].mxu0 }
 0x14d   : > { %v439_v16 = vpop.f32.mrb[2].mxu0 }
 0x14e   : > { %460 = vperm.xlu1 %1108, %v437_v14   ;;  %444 = vperm.xlu0 %1106, %v437_v14   ;;  %v963_v17 = vpop.f32.mrb[3].mxu0 }
 0x152   : > { %1109 = vset.pattern.permute.xlu1 %v1309_v18  ;;  %1107 = vset.pattern.permute.xlu0 %v1310_v19 }
 0x153   : > { %468 = vperm.xlu1 %1109, %v437_v14   ;;  %452 = vperm.xlu0 %1107, %v437_v14  }
 0x157   : > { %1110 = vset.pattern.permute.xlu0 %v1309_v18 }
 0x1cd   : > { %v461_v20 = vpop.permute.xlu1 %460  ;;  %v445_v21 = vpop.permute.xlu0 %444 }
 0x1ce   : > { %vm447_vm1 = vcmp.gt.f32.partialorder %v445_v21, %v437_v14  ;;  %vm463_vm2 = vcmp.gt.f32.partialorder %v461_v20, %v437_v14 }
 0x1cf   : > { %v885_v24 = vsel %vm447_vm1, 1.0, %v1305_v2  ;;  %v887_v27 = vsel %vm463_vm2, 1.0, %v1305_v2 }
 0x1d2   : > { %v469_v22 = vpop.permute.xlu1 %468  ;;  %v453_v23 = vpop.permute.xlu0 %452 }
 0x1d3   : > { %vm455_vm3 = vcmp.gt.f32.partialorder %v453_v23, %v437_v14  ;;  %vm471_vm4 = vcmp.gt.f32.partialorder %v469_v22, %v437_v14 }
 0x1d4   : > { %v886_v25 = vsel %vm455_vm3, 1.0, %v1305_v2  ;;  %v888_v29 = vsel %vm471_vm4, 1.0, %v1305_v2 }
 0x1d5   : > { %v458_v26 = vadd.f32 %v886_v25, %v885_v24 }
 0x1d7   : > { %v466_v28 = vadd.f32 %v887_v27, %v458_v26 }
 0x1d9   : > { %v474_v30 = vadd.f32 %v888_v29, %v466_v28 }
 0x1db   : > { %vm475_vm6 = vcmp.lt.f32.partialorder %v474_v30, 2.0 }
 0x1dc   : > { %v476_v31 = vsel %vm475_vm6, %v437_v14, inf }
 0x1dd   : > { %v478_v32 = vsel %vm477_vm5, %v476_v31, inf }
 0x1de   : > { %479 = vmin.xlane.f32.xlu1 %v478_v32 }
 0x26b   : > { %v480_v33 = vpop.xlane.xlu1 %479 }
 0x26c   : > { %vm481_vm7 = vcmp.ge.f32.partialorder %v437_v14, %v480_v33 }
 0x26d   : > { %v482_v34 = vsel %vm481_vm7, %v437_v14, -inf }
 0x26e   : > { %v483_v35 = vsel %vm477_vm5, %v482_v34, -inf }
 0x26f   : > { %484 = vmax.xlane.f32.xlu0 %v483_v35 }
 0x2fc   : > { %v485_v36 = vpop.xlane.xlu0 %484 }
 0x2fd   : > { %v486_v37 = vsub.f32 %v482_v34, %v485_v36 }
 0x2ff   : > { %v487_v38 = vmul.f32 1.442695, %v486_v37 }
 0x301   : > { %1119 = vpow2.f32 %v487_v38 }
 0x30b   : > { %v1120_v39 = vpop.eup %1119 }
 0x30c   : > { %v489_v40 = vsel %vm477_vm5, %v1120_v39, 0.0 }
 0x30d   : > { %490 = vadd.xlane.f32.xlu0 %v489_v40 }
 0x39a   : > { %v491_v41 = vpop.xlane.xlu0 %490 }
 0x39b   : > { %1121 = vrcp.f32 %v491_v41 }
 0x3a5   : > { %v1122_v42 = vpop.eup %1121 }
 0x3a6   : > { %v493_v43 = vmul.f32 %v1122_v42, %v1120_v39 }
 0x3a8   : > { %494 = vst.msk [vmem:[#allocation2] sm:$0xff] %vm477_vm5, %v493_v43 }
 0x3a9 PF: > { %s915_s13 = sshll.u32 %s1283_s27, 6  ;;  %v1311_v44 = vmov 0.0   ;;  %vm1312_vm8 = vmmov 0   ;;  %v735_v61 = vlaneseq  ;;  %v737_v62 = vstv %s1283_s27  ;;  %s515_s19 = scalar_lea.vmem %s1634_s4, %s1283_s27 }
 0x3aa   : > { %964 = vmatprep.subr.bf16.mxu0 %v1311_v44  ;;  %980 = vmatprep.mubr.msk.bf16.mxu0 %vm1312_vm8, %v1311_v44  ;;  %s1538_s20 = scalar_lea.vmem [#allocation3], %s915_s13  ;;  %s1543_s11 = scalar_lea.vmem [#allocation6], %s915_s13  ;;  %vm741_vm9 = vcmask 31744   ;;  %v892_v3 = vld [vmem:[%s515_s19] ss:$0 sm:$0xff]  ;;  %v745_v21 = vld [vmem:[%s1502_s18] sm:$0xff] }
 0x3ab   : > { %v1123_v45 = vld [vmem:[%s1538_s20] sm:$0xff]   ;;  %984 = vmatprep.subr.bf16.mxu1 %v1311_v44  ;;  %1000 = vmatprep.mubr.msk.bf16.mxu1 %vm1312_vm8, %v1311_v44  ;;  %v1124_v46 = vld [vmem:[%s1538_s20 + $0x8] sm:$0xff]   ;;  %v1125_v47 = vld [vmem:[%s1538_s20 + $0x10] sm:$0xff]   ;;  %v736_v63 = vand.u32 127, %v735_v61  ;;  %s535_s16 = scalar_lea.vmem %s1636_s6, %s1283_s27  ;;  %s911_s22 = sshll.u32 %s1287_s28, 7 }
 0x3ac   : > { %965 = vmatpush3.bf16.msra.mxu0 %v1123_v45  ;;  %v1131_v48 = vld [vmem:[%s1543_s11] sm:$0xff]   ;;  %v1126_v49 = vld [vmem:[%s1538_s20 + $0x18] sm:$0xff]   ;;  %v1132_v50 = vld [vmem:[%s1543_s11 + $0x8] sm:$0xff]   ;;  %s763_s12 = sshll.u32 %s1502_s18, 4  ;;  %s1574_s9 = scalar_lea.hbm %s1637_s7, %s911_s22  ;;  %s1576_s12 = int_to_ptr.vmem [resolvable:$true] %s763_s12 }
 0x3ad   : > { %966 = vmatprep.subr.bf16.mxu0 %v1311_v44  ;;  %985 = vmatpush3.bf16.msra.mxu1 %v1131_v48  ;;  %v1127_v51 = vld [vmem:[%s1538_s20 + $0x20] sm:$0xff]   ;;  %v1133_v52 = vld [vmem:[%s1543_s11 + $0x10] sm:$0xff]   ;;  %v1128_v53 = vld [vmem:[%s1538_s20 + $0x28] sm:$0xff]   ;;  %vm738_vm10 = vcmp.eq.s32.totalorder %v736_v63, %v737_v62  ;;  %s750_s27 = scalar_lea.sflag [#allocation5], %s316_s26  ;;  %s1197_s17 = scalar_lea.vmem %s1576_s12, 128 }
 0x3ae   : > { %986 = vmatprep.subr.bf16.mxu1 %v1311_v44  ;;  %v1129_v54 = vld [vmem:[%s1538_s20 + $0x30] sm:$0xff]   ;;  %v1130_v55 = vld [vmem:[%s1538_s20 + $0x38] sm:$0xff]   ;;  %v1135_v57 = vld [vmem:[%s1543_s11 + $0x20] sm:$0xff]   ;;  %p1198_p10 = scmp.ne.s32.totalorder %s1576_s12, %s1197_s17  ;;  %p1661_p13 = scmp.ne.s32.totalorder %s1651_s14, 0 }
 0x3af   : > { %v1134_v56 = vld [vmem:[%s1543_s11 + $0x18] sm:$0xff]   ;;  %v1136_v58 = vld [vmem:[%s1543_s11 + $0x28] sm:$0xff]   ;;  %v1137_v59 = vld [vmem:[%s1543_s11 + $0x30] sm:$0xff]   ;;  %s1313_s28 = smov [#allocation8]  }
 0x3b0   : > { %967 = vmatpush3.bf16.msra.mxu0 %v1124_v46  ;;  %v1138_v60 = vld [vmem:[%s1543_s11 + $0x38] sm:$0xff]   ;;  %v901_v15 = vld [vmem:[%s535_s16] ss:$0 sm:$0xff]  ;;  %p1199_p1 = pnand %p1198_p10, %p1661_p13  ;;  %s1201_s13 = sshll.u32 %s1313_s28, 4  ;;  %s1202_s13 = int_to_ptr.vmem [resolvable:$false] %s1201_s13 }
 0x3b1   : > { %968 = vmatprep.subr.bf16.mxu0 %v1311_v44  ;;  %987 = vmatpush3.bf16.msra.mxu1 %v1132_v50  ;;  %s1203_s20 = scalar_lea.vmem %s1202_s13, 256  ;;  %p1204_p5 = scmp.lt.s32.totalorder %s1576_s12, %s1202_s13 }
 0x3b2   : > { %988 = vmatprep.subr.bf16.mxu1 %v1311_v44  ;;  %p1200_p4 = pneg %p1199_p1  ;;  %p1205_p6 = scmp.lt.s32.totalorder %s1203_s20, %s1197_s17 }
 0x3b4   : > { %969 = vmatpush3.bf16.msra.mxu0 %v1125_v47  ;;  %p1206_p7 = por %p1205_p6, %p1204_p5 }
 0x3b5   : > { %970 = vmatprep.subr.bf16.mxu0 %v1311_v44  ;;  %989 = vmatpush3.bf16.msra.mxu1 %v1133_v52 }
 0x3b6   : > { %990 = vmatprep.subr.bf16.mxu1 %v1311_v44  ;;  %p1207_p8 = pnand %p1206_p7, %p1200_p4 }
 0x3b8   : > { %971 = vmatpush3.bf16.msra.mxu0 %v1126_v49 }
 0x3b9   : > { %972 = vmatprep.subr.bf16.mxu0 %v1311_v44  ;;  %991 = vmatpush3.bf16.msra.mxu1 %v1134_v56 }
 0x3ba   : > { %992 = vmatprep.subr.bf16.mxu1 %v1311_v44 }
 0x3bc   : > { %973 = vmatpush3.bf16.msra.mxu0 %v1127_v51 }
 0x3bd   : > { %974 = vmatprep.subr.bf16.mxu0 %v1311_v44  ;;  %993 = vmatpush3.bf16.msra.mxu1 %v1135_v57 }
 0x3be   : > { %994 = vmatprep.subr.bf16.mxu1 %v1311_v44 }
 0x3c0   : > { %975 = vmatpush3.bf16.msra.mxu0 %v1128_v53 }
 0x3c1   : > { %976 = vmatprep.subr.bf16.mxu0 %v1311_v44  ;;  %995 = vmatpush3.bf16.msra.mxu1 %v1136_v58 }
 0x3c2   : > { %996 = vmatprep.subr.bf16.mxu1 %v1311_v44 }
 0x3c4   : > { %977 = vmatpush3.bf16.msra.mxu0 %v1129_v54 }
 0x3c5   : > { %978 = vmatprep.subr.bf16.mxu0 %v1311_v44  ;;  %997 = vmatpush3.bf16.msra.mxu1 %v1137_v59 }
 0x3c6   : > { %998 = vmatprep.subr.bf16.mxu1 %v1311_v44 }
 0x3c8   : > { %979 = vmatpush3.bf16.msra.mxu0 %v1130_v55 }
 0x3c9   : > { %999 = vmatpush3.bf16.msra.mxu1 %v1138_v60 }
 0x3cb   : > { %981 = vmatmul.mubr.bf16.vlgmr.msra.gmra.mrb[0].mxu0 %v1500_v0  ;;  %v739_v0 = vld [vmem:[#allocation2] sm:$0xff] }
 0x3cc   : > { %v740_v1 = vsel %vm738_vm10, %v739_v0, 0.0 }
 0x3cd   : > { %v742_v2 = vsel %vm741_vm9, %v740_v1, 0.0 }
 0x3ce   : > { %743 = vadd.xlane.f32.xlu0 %v742_v2 }
 0x45b   : > { %v744_v17 = vpop.xlane.xlu0 %743 }
 0x49e   : > { %v625_v4 = vpop.f32.mrb[0].mxu0 }
 0x49f   : > { %v626_v5 = vadd.f32 %v892_v3, %v625_v4  ;;  %v982_v6 = vpop.f32.mrb[1].mxu0 }
 0x4a0   : > { %v628_v7 = vpop.f32.mrb[2].mxu0 }
 0x4a1   : > { %v632_v8 = vmul.f32 0.70710677, %v626_v5  ;;  %v983_v9 = vpop.f32.mrb[3].mxu0  ;;  %v631_v11 = vmul.f32 0.5, %v626_v5 }
 0x4a3   : > { %1139 = verf.f32 %v632_v8 }
 0x4ad   : > { %v1140_v10 = vpop.eup %1139 }
 0x4ae   : > { %v634_v12 = vadd.f32 1.0, %v1140_v10 }
 0x4b0   : > { %v635_v13 = vmul.f32 %v634_v12, %v631_v11 }
 0x4b2   : > { %v636_v14 = vpack.c.bf16 %v635_v13, %v635_v13 }
 0x4b4   : > { %1001 = vmatmul.mubr.bf16.vlgmr.msra.gmra.mrb[0].mxu1 %v636_v14 }
 0x587   : > { %v729_v16 = vpop.f32.mrb[0].mxu1 }
 0x588   : > { %v730_v18 = vadd.f32 %v901_v15, %v729_v16  ;;  %v1002_v19 = vpop.f32.mrb[1].mxu1 }
 0x589   : > { %v732_v20 = vpop.f32.mrb[2].mxu1 }
 0x58a   : > { %v746_v22 = vmul.f32 %v744_v17, %v730_v18  ;;  %v1003_v23 = vpop.f32.mrb[3].mxu1 }
 0x58c   : > { %v747_v24 = vadd.f32 %v746_v22, %v745_v21 }
 0x58e   : > { %748 = vst [vmem:[%s1502_s18] sm:$0xff] %v747_v24 }
 0x58f   : > { %1210 = shalt.err (!%p1207_p8)
}
 0x590   : > { %s1211_s26 = scalar_lea.hbm %s1574_s9, 128  ;;  %s1215_s21 = scalar_lea.hbm %s1637_s7, 256 }
 0x591   : > { %p1212_p11 = scmp.ne.s32.totalorder %s1574_s9, %s1211_s26  ;;  %p1216_p9 = scmp.lt.u32.totalorder %s1574_s9, %s1637_s7 }
 0x592   : > { %p1217_p0 = scmp.lt.u32.totalorder %s1215_s21, %s1211_s26  ;;  %p1219_p10 = scmp.lt.u32.totalorder %s1211_s26, %s1574_s9 }
 0x593   : > { %p1213_p12 = pnand %p1212_p11, %p1661_p13 }
 0x594   : > { %p1218_p2 = por %p1217_p0, %p1216_p9 }
 0x595   : > { %p1214_p3 = pneg %p1213_p12 }
 0x596   : > { %p1220_p1 = por %p1219_p10, %p1218_p2 }
 0x598   : > { %p1221_p4 = pnand %p1220_p1, %p1214_p3 }
 0x59a   : > { %1224 = shalt.err (!%p1221_p4)
}
 0x59b   : > { %1012 = dma.vmem_to_hbm [thread:$0]  (%p1661_p13), %s1576_s12, 128, %s1574_s9, %s750_s27  }
 0x59c PF: > { %s1662_s29 = sld [smem:[#allocation17_spill]]  ;;  %p1029_p5 = scmp.ge.s32.totalorder %s1299_s8, 2 }
 0x59d   : > { %s775_s15 = sand.u32 1, %s1271_s24  }
 0x59e   : > { %s776_s16 = scalar_lea.sflag [#allocation5], %s775_s15 }
 0x5a2   : > { %p1663_p6 = scmp.ne.s32.totalorder %s1662_s29, 0 }
 0x5a4   : > { %p1022_p7 = pnand %p1029_p5, %p1663_p6 }
 0x5a6   : > { %1266 = dma.done.wait (!%p1022_p7), %s776_s16, 128  }
 0x5a7   : > { %1268 = vsyncadd (!%p1022_p7), %s776_s16, 4294967168  ;;  %s22_s8 = sadd.s32 1, %s1299_s8   ;;  %s1664_s22 = sld [smem:[#allocation12_spill]] }
 0x5a8   : > { %p19_p8 = scmp.ge.s32.totalorder %s22_s8, 10   ;;  %s1665_s26 = sld [smem:[#allocation18_spill]] }
 0x5a9   : > { %s1666_s27 = sld [smem:[#allocation13_spill]]  ;;  %s1667_s28 = sld [smem:[#allocation14_spill]] }
 0x5aa   : > { %s1668_s29 = sld [smem:[#allocation15_spill]]  ;;  %s1669_s30 = sld [smem:[#allocation16_spill]] }
 0x5ab   : > { %s1670_s24 = smov %s1275_s25  ;;  %21 = sbr.rel (!%p19_p8) target bundleno = 7 (0x7), region = 100 }
 0x5ad   : > { %s1671_s25 = smov %s1664_s22 }
 0x5b2   :  { %781 = vsyncpa [#allocation4], 1 }
 0x5b3   :  { %783 = vsyncpa [#allocation4 + $0x1], 1 }
 0x5b4   :  { %784 = vsyncpa [#allocation7], 1 }
 0x5b5   :  { %785 = vsyncpa [#allocation5], 1 }
 0x5b6   :  { %787 = vsyncpa [#allocation5 + $0x1], 1 }

</bundles_post_ra>
